<compile_context>
chip_gen: v6e
topology: v6e:2x2x1
jax: 0.10.0
libtpu: 0.0.40
codegen_flags: <defaults>
</compile_context>

<pallas_src>
import functools
import math

import jax
import jax.numpy as jnp
from jax.experimental import pallas as pl
from jax.experimental.pallas import tpu as pltpu

_LANE = 128


def _round_up(v, m):
    return (v + m - 1) // m * m


# ----------------------------- kernels --------------------------------------

def _transform1_kernel(x_ref, w1_ref, dinv_ref, m1_ref):
    # m1 = dinv * (x @ W1)   (layer-1 feature transform, pre-scaled messages)
    xw = jnp.dot(x_ref[...], w1_ref[...], preferred_element_type=jnp.float32)
    m1_ref[...] = (dinv_ref[...] * xw).astype(m1_ref.dtype)


def _layer1_kernel(a_ref, m1_ref, dinv_ref, b1_ref, w2_ref, m2_ref):
    # h = relu(dinv * (A_hat @ m1) + b1)           (GCNConv #1 + ReLU)
    agg = jnp.dot(a_ref[...], m1_ref[...], preferred_element_type=jnp.float32)
    h = jnp.maximum(dinv_ref[...] * agg + b1_ref[...], 0.0)
    # F.dropout(p, training=False) == identity in eval mode.
    # m2 = dinv * (h @ W2)                         (GCNConv #2 feature transform)
    hw = jnp.dot(h, w2_ref[...], preferred_element_type=jnp.float32)
    m2_ref[...] = (dinv_ref[...] * hw).astype(m2_ref.dtype)


def _layer2_kernel(a_ref, m2_ref, dinv_ref, b2_ref, o_ref, *, num_classes):
    # z = dinv * (A_hat @ m2) + b2                 (GCNConv #2 aggregation + bias)
    agg = jnp.dot(a_ref[...], m2_ref[...], preferred_element_type=jnp.float32)
    z = dinv_ref[...] * agg + b2_ref[...]
    # log_softmax over the real classes only: padded lanes masked out.
    col = jax.lax.broadcasted_iota(jnp.int32, z.shape, 1)
    z = jnp.where(col < num_classes, z, jnp.float32(-1e30))
    m = jnp.max(z, axis=1, keepdims=True)
    s = z - m
    lse = jnp.log(jnp.sum(jnp.exp(s), axis=1, keepdims=True))
    o_ref[...] = s - lse


# ----------------------------- wrapper ---------------------------------------

def gcn_forward(x, edge_index, params, *, tile_m=None):
    x = x.astype(jnp.float32)
    N, F_in = x.shape
    H = params["w1"].shape[1]
    C = params["w2"].shape[1]

    F_pad = _round_up(F_in, _LANE)
    H_pad = _round_up(H, _LANE)
    C_pad = _round_up(C, _LANE)
    N_pad = _round_up(N, _LANE)
    if tile_m is None:
        # >=128 rows for the MXU row dim; small enough that a double-buffered
        # (tile_m, N_pad) bf16 A_hat stream fits v7x's 64 MiB VMEM.
        tile_m = min(256, N_pad)
    N_pad = _round_up(N_pad, tile_m)
    grid = (N_pad // tile_m,)

    # Graph prep (plain-JAX glue): O(E) scatter, NO O(N^2) normalization pass.
    src = edge_index[0]
    dst = edge_index[1]
    A_hat = (jnp.zeros((N_pad, N_pad), jnp.float32)
             .at[dst, src].add(1.0)
             .at[jnp.arange(N), jnp.arange(N)].add(1.0))
    deg = jnp.sum(A_hat, axis=1)
    dinv = jnp.where(deg > 0.0, jax.lax.rsqrt(jnp.maximum(deg, 1e-12)), 0.0)
    dinv = dinv.reshape(N_pad, 1).astype(jnp.float32)
    a_bf16 = A_hat.astype(jnp.bfloat16)            # 0/1 entries: exact in bf16

    # Zero-pad features / params to lane-dense shapes.
    xp = jnp.zeros((N_pad, F_pad), jnp.float32).at[:N, :F_in].set(x)
    w1p = jnp.zeros((F_pad, H_pad), jnp.float32).at[:F_in, :H].set(
        params["w1"].astype(jnp.float32))
    b1p = jnp.zeros((1, H_pad), jnp.float32).at[0, :H].set(
        params["b1"].astype(jnp.float32))
    w2p = jnp.zeros((H_pad, C_pad), jnp.float32).at[:H, :C].set(
        params["w2"].astype(jnp.float32))
    b2p = jnp.zeros((1, C_pad), jnp.float32).at[0, :C].set(
        params["b2"].astype(jnp.float32))

    cparams = pltpu.CompilerParams(
        dimension_semantics=("parallel",),          # megacore row-sharding (v7x)
        vmem_limit_bytes=48 * 1024 * 1024)          # v7x-safe (64 MiB physical)

    def row(w):
        return pl.BlockSpec((tile_m, w), lambda i: (i, 0))

    def res(shape):
        return pl.BlockSpec(shape, lambda i: (0, 0))

    # 1) layer-1 feature transform: m1 = dinv * (x @ W1)  -> bf16
    m1 = pl.pallas_call(
        _transform1_kernel,
        grid=grid,
        in_specs=[row(F_pad), res((F_pad, H_pad)), row(1)],
        out_specs=row(H_pad),
        out_shape=jax.ShapeDtypeStruct((N_pad, H_pad), jnp.bfloat16),
        compiler_params=cparams,
        cost_estimate=pl.CostEstimate(
            flops=2 * N_pad * F_pad * H_pad, transcendentals=0,
            bytes_accessed=4 * (N_pad * F_pad + F_pad * H_pad)
            + 2 * N_pad * H_pad),
    )(xp, w1p, dinv)

    # 2) layer-1 aggregation + ReLU + layer-2 transform -> m2 (bf16)
    m2 = pl.pallas_call(
        _layer1_kernel,
        grid=grid,
        in_specs=[row(N_pad), res((N_pad, H_pad)), row(1),
                  res((1, H_pad)), res((H_pad, C_pad))],
        out_specs=row(C_pad),
        out_shape=jax.ShapeDtypeStruct((N_pad, C_pad), jnp.bfloat16),
        compiler_params=cparams,
        cost_estimate=pl.CostEstimate(
            flops=2 * (N_pad * N_pad * H_pad + N_pad * H_pad * C_pad),
            transcendentals=0,
            bytes_accessed=2 * (N_pad * N_pad + N_pad * H_pad + N_pad * C_pad)
            + 4 * (H_pad * C_pad + H_pad)),
    )(a_bf16, m1, dinv, b1p, w2p)

    # 3) layer-2 aggregation + bias + masked log_softmax
    out = pl.pallas_call(
        functools.partial(_layer2_kernel, num_classes=C),
        grid=grid,
        in_specs=[row(N_pad), res((N_pad, C_pad)), row(1), res((1, C_pad))],
        out_specs=row(C_pad),
        out_shape=jax.ShapeDtypeStruct((N_pad, C_pad), jnp.float32),
        compiler_params=cparams,
        cost_estimate=pl.CostEstimate(
            flops=2 * N_pad * N_pad * C_pad,
            transcendentals=N_pad * C_pad + N_pad,
            bytes_accessed=2 * (N_pad * N_pad + N_pad * C_pad)
            + 4 * (N_pad * C_pad + C_pad)),
    )(a_bf16, m2, dinv, b2p)

    return out[:N, :C]


def _reference_forward(x, edge_index, params):
    """Pure-JAX f32 reference mirroring the PyTorch/PyG semantics."""
    N = x.shape[0]
    src, dst = edge_index[0], edge_index[1]
    A = jnp.zeros((N, N), jnp.float32).at[dst, src].add(1.0)
    A_hat = A + jnp.eye(N, dtype=jnp.float32)
    deg = jnp.sum(A_hat, axis=1)
    dinv = jnp.where(deg > 0.0, 1.0 / jnp.sqrt(deg), 0.0)
    adj = dinv[:, None] * A_hat * dinv[None, :]

    h = jnp.maximum(adj @ (x @ params["w1"]) + params["b1"], 0.0)
    z = adj @ (h @ params["w2"]) + params["b2"]
    return jax.nn.log_softmax(z, axis=1)


if __name__ == "__main__":
    # N nodes, F input features, H hidden units, C classes.
    N, F_in, H, C = 32, 16, 32, 8

    key = jax.random.PRNGKey(0)
    k_x, k_w1, k_b1, k_w2, k_b2 = jax.random.split(key, 5)

    x = jax.random.normal(k_x, (N, F_in), jnp.float32)
    params = {
        "w1": jax.random.normal(k_w1, (F_in, H), jnp.float32) * (1.0 / math.sqrt(F_in)),
        "b1": jax.random.normal(k_b1, (H,), jnp.float32) * 0.1,
        "w2": jax.random.normal(k_w2, (H, C), jnp.float32) * (1.0 / math.sqrt(H)),
        "b2": jax.random.normal(k_b2, (C,), jnp.float32) * 0.1,
    }

    # Deterministic undirected ring graph (edges in both directions).
    srcs = jnp.arange(N, dtype=jnp.int32)
    dsts = (srcs + 1) % N
    edge_index = jnp.stack(
        [jnp.concatenate([srcs, dsts]), jnp.concatenate([dsts, srcs])], axis=0)

    y = jax.block_until_ready(gcn_forward(x, edge_index, params))
    y_ref = _reference_forward(x, edge_index, params)

    assert y.shape == (N, C)
    assert bool(jnp.all(jnp.isfinite(y)))
    err = float(jnp.max(jnp.abs(y - y_ref)))
    assert err < 5e-2, f"max abs err {err}"  # bf16 MXU inputs, f32 accumulation

    print("KERNEL_OK")
</pallas_src>

<mosaic_0001>
module attributes {stable_mosaic.version = 11 : i64} {
  func.func @_transform1_kernel(%arg0: i32, %arg1: memref<128x128xf32, #tpu.memory_space<vmem>>, %arg2: memref<128x128xf32, #tpu.memory_space<vmem>>, %arg3: memref<128x1xf32, #tpu.memory_space<vmem>>, %arg4: memref<128x128xbf16, #tpu.memory_space<vmem>>) attributes {dimension_semantics = [#tpu.dimension_semantics<parallel>], iteration_bounds = array<i64: 1>, scalar_prefetch = 0 : i64, scratch_operands = 0 : i64, tpu.core_type = #tpu.core_type<tc>, window_params = [{transform_indices = @transform_0, window_bounds = array<i64: 128, 128>}, {pipeline_mode = #tpu.pipeline_mode<synchronous>, transform_indices = @transform_1, window_bounds = array<i64: 128, 128>}, {transform_indices = @transform_2, window_bounds = array<i64: 128, 1>}, {transform_indices = @transform_3, window_bounds = array<i64: 128, 128>}]} {
    %c0 = arith.constant 0 : index
    %c0_0 = arith.constant 0 : index
    %0 = vector.load %arg1[%c0, %c0_0] : memref<128x128xf32, #tpu.memory_space<vmem>>, vector<128x128xf32>
    %c0_1 = arith.constant 0 : index
    %c0_2 = arith.constant 0 : index
    %1 = vector.load %arg2[%c0_1, %c0_2] : memref<128x128xf32, #tpu.memory_space<vmem>>, vector<128x128xf32>
    %cst = arith.constant dense<0.000000e+00> : vector<128x128xf32>
    %2 = tpu.matmul %0, %1, %cst {dimension_numbers = #tpu.dot_dimension_numbers<[1], [0], [0], [1], [0, 0, 1, 1], [], []>} : vector<128x128xf32>, vector<128x128xf32>, vector<128x128xf32> -> vector<128x128xf32>
    %c0_3 = arith.constant 0 : index
    %c0_4 = arith.constant 0 : index
    %3 = vector.load %arg3[%c0_3, %c0_4] : memref<128x1xf32, #tpu.memory_space<vmem>>, vector<128x1xf32>
    %4 = vector.broadcast %3 : vector<128x1xf32> to vector<128x128xf32>
    %5 = arith.mulf %4, %2 : vector<128x128xf32>
    %6 = arith.truncf %5 : vector<128x128xf32> to vector<128x128xbf16>
    %c0_5 = arith.constant 0 : index
    %c0_6 = arith.constant 0 : index
    %7 = vector.load %arg4[%c0_5, %c0_6] : memref<128x128xbf16, #tpu.memory_space<vmem>>, vector<128x128xbf16>
    tpu.vector_store %arg4[%c0_5, %c0_6], %6 {strides = array<i32>} : memref<128x128xbf16, #tpu.memory_space<vmem>>, vector<128x128xbf16>,
    return
  }
  func.func @transform_0(%arg0: i32) -> (i32, i32) {
    %c0_i32 = arith.constant 0 : i32
    %c0_i32_0 = arith.constant 0 : i32
    return %arg0, %c0_i32 : i32, i32
  }
  func.func @transform_1(%arg0: i32) -> (i32, i32) {
    %c0_i32 = arith.constant 0 : i32
    %c0_i32_0 = arith.constant 0 : i32
    %c0_i32_1 = arith.constant 0 : i32
    return %c0_i32, %c0_i32_0 : i32, i32
  }
  func.func @transform_2(%arg0: i32) -> (i32, i32) {
    %c0_i32 = arith.constant 0 : i32
    %c0_i32_0 = arith.constant 0 : i32
    return %arg0, %c0_i32 : i32, i32
  }
  func.func @transform_3(%arg0: i32) -> (i32, i32) {
    %c0_i32 = arith.constant 0 : i32
    %c0_i32_0 = arith.constant 0 : i32
    return %arg0, %c0_i32 : i32, i32
  }
}

</mosaic_0001>

<bundles_post_ra>
// kernel: tpu_custom_call.1
= control target key start
LH: loop header
LB: loop body
LE: loop exit
PB: predicated region body
PF: predicated region fallthrough
CT: control target
= control target key end

     0   :  { %8 = vsyncpa [#allocation3], 0  ;;  %s796_s0 = inlined_call_operand.vmem [shape: f32[128,128], index: 0, kind: input, shape index: {}]   ;;  %s797_s1 = inlined_call_operand.hbm [shape: f32[128,128], index: 1, kind: input, shape index: {}]   ;;  %s798_s2 = inlined_call_operand.vmem [shape: f32[128,1], index: 2, kind: input, shape index: {}]   ;;  %s799_s3 = inlined_call_operand.hbm [shape: bf16[128,128], index: 3, kind: output, shape index: {}]  }
   0x1   :  { %9 = vsyncpa [#allocation4], 0  ;;  %s667_s12 = smov [#allocation2]  }
   0x2   :  { %s17_s13 = sshll.u32 %s667_s12, 4  ;;  %s18_s13 = int_to_ptr.vmem [resolvable:$true] %s17_s13 }
   0x3   :  { %s631_s14 = scalar_lea.vmem %s18_s13, 2048  ;;  %p636_p1 = scmp.lt.s32.totalorder %s18_s13, %s18_s13 }
   0x4   :  { %p632_p0 = scmp.ne.s32.totalorder %s18_s13, %s631_s14  ;;  %p637_p2 = scmp.lt.s32.totalorder %s631_s14, %s631_s14 }
   0x6   :  { %p638_p3 = por %p637_p2, %p636_p1 }
   0x8   :  { %p639_p4 = pnand %p638_p3, %p632_p0 }
   0xa   :  { %642 = shalt.err (!%p639_p4)
}
   0xb   :  { %s668_s15 = smov 128   ;;  %s669_s16 = smov 8  }
   0xc   :  { %23 = dma.hbm_to_vmem [thread:$0]  %s797_s1, 2048, %s18_s13, [#allocation3], %s668_s15, %s668_s15, %s669_s16  }
   0xd   :  { %663 = dma.done.wait [#allocation3], 2048  }
   0xe   :  { %664 = vsyncadd [#allocation3], 4294965248  ;;  %v670_v0 = vmov 0   ;;  %v60_v1 = vld [vmem:[#allocation2 + $0x78] sm:$0xff]  ;;  %v59_v2 = vld [vmem:[#allocation2 + $0x70] sm:$0xff] }
   0xf   :  { %622 = vset.pattern.permute.xlu1 %v670_v0  ;;  %621 = vset.pattern.permute.xlu0 %v670_v0  ;;  %v58_v3 = vld [vmem:[#allocation2 + $0x68] sm:$0xff]  ;;  %v57_v4 = vld [vmem:[#allocation2 + $0x60] sm:$0xff]  ;;  %v56_v5 = vld [vmem:[#allocation2 + $0x58] sm:$0xff] }
  0x10   :  { %526 = vmatprep.subr.mxu0 %v60_v1  ;;  %582 = vmatprep.subr.mxu1 %v60_v1  ;;  %v55_v6 = vld [vmem:[#allocation2 + $0x50] sm:$0xff]  ;;  %v54_v7 = vld [vmem:[#allocation2 + $0x48] sm:$0xff]  ;;  %v53_v8 = vld [vmem:[#allocation2 + $0x40] sm:$0xff] }
  0x11   :  { %527 = vmatpush3.msra.mxu0 %v60_v1  ;;  %598 = vmatpush3.msra.mxu1 %v60_v1  ;;  %v52_v9 = vld [vmem:[#allocation2 + $0x38] sm:$0xff]  ;;  %v51_v10 = vld [vmem:[#allocation2 + $0x30] sm:$0xff]  ;;  %v50_v11 = vld [vmem:[#allocation2 + $0x28] sm:$0xff] }
  0x12   :  { %528 = vmatprep.subr.mxu0 %v59_v2  ;;  %583 = vmatprep.subr.mxu1 %v59_v2  ;;  %v49_v12 = vld [vmem:[#allocation2 + $0x20] sm:$0xff]  ;;  %v48_v13 = vld [vmem:[#allocation2 + $0x18] sm:$0xff]  ;;  %v47_v14 = vld [vmem:[#allocation2 + $0x10] sm:$0xff] }
  0x13   :  { %529 = vmatpush3.msra.mxu0 %v59_v2  ;;  %599 = vmatpush3.msra.mxu1 %v59_v2  ;;  %v46_v15 = vld [vmem:[#allocation2 + $0x8] sm:$0xff]  ;;  %v45_v16 = vld [vmem:[#allocation2] sm:$0xff]  ;;  %v31_v21 = vld [vmem:[%s796_s0 + $0x10] sm:$0xff] }
  0x14   :  { %530 = vmatprep.subr.mxu0 %v58_v3  ;;  %584 = vmatprep.subr.mxu1 %v58_v3  ;;  %v29_v17 = vld [vmem:[%s796_s0] sm:$0xff]  ;;  %v30_v19 = vld [vmem:[%s796_s0 + $0x8] sm:$0xff]  ;;  %v39_v22 = vld [vmem:[%s796_s0 + $0x50] sm:$0xff] }
  0x15   :  { %531 = vmatpush3.msra.mxu0 %v58_v3  ;;  %600 = vmatpush3.msra.mxu1 %v58_v3  ;;  %v37_v18 = vld [vmem:[%s796_s0 + $0x40] sm:$0xff]  ;;  %v38_v20 = vld [vmem:[%s796_s0 + $0x48] sm:$0xff]  ;;  %v208_v23 = vld [vmem:[%s798_s2 + $0x10] sm:$0xff] }
  0x16   :  { %532 = vmatprep.subr.mxu0 %v57_v4  ;;  %585 = vmatprep.subr.mxu1 %v57_v4  ;;  %v206_v24 = vld [vmem:[%s798_s2] sm:$0xff]  ;;  %v32_v25 = vld [vmem:[%s796_s0 + $0x18] sm:$0xff]  ;;  %v207_v30 = vld [vmem:[%s798_s2 + $0x8] sm:$0xff] }
  0x17   :  { %533 = vmatpush3.msra.mxu0 %v57_v4  ;;  %601 = vmatpush3.msra.mxu1 %v57_v4  ;;  %v40_v26 = vld [vmem:[%s796_s0 + $0x58] sm:$0xff]  ;;  %v33_v27 = vld [vmem:[%s796_s0 + $0x20] sm:$0xff]  ;;  %v34_v31 = vld [vmem:[%s796_s0 + $0x28] sm:$0xff] }
  0x18   :  { %534 = vmatprep.subr.mxu0 %v56_v5  ;;  %586 = vmatprep.subr.mxu1 %v56_v5  ;;  %v41_v28 = vld [vmem:[%s796_s0 + $0x60] sm:$0xff]  ;;  %v209_v29 = vld [vmem:[%s798_s2 + $0x18] sm:$0xff]  ;;  %v42_v32 = vld [vmem:[%s796_s0 + $0x68] sm:$0xff] }
  0x19   :  { %535 = vmatpush3.msra.mxu0 %v56_v5  ;;  %602 = vmatpush3.msra.mxu1 %v56_v5  ;;  %v35_v33 = vld [vmem:[%s796_s0 + $0x30] sm:$0xff]  ;;  %v211_v35 = vld [vmem:[%s798_s2 + $0x28] sm:$0xff]  ;;  %v210_v36 = vld [vmem:[%s798_s2 + $0x20] sm:$0xff] }
  0x1a   :  { %536 = vmatprep.subr.mxu0 %v55_v6  ;;  %587 = vmatprep.subr.mxu1 %v55_v6  ;;  %v43_v34 = vld [vmem:[%s796_s0 + $0x70] sm:$0xff]  ;;  %v36_v37 = vld [vmem:[%s796_s0 + $0x38] sm:$0xff]  ;;  %v215_v41 = vld [vmem:[%s798_s2 + $0x48] sm:$0xff] }
  0x1b   :  { %537 = vmatpush3.msra.mxu0 %v55_v6  ;;  %603 = vmatpush3.msra.mxu1 %v55_v6  ;;  %v44_v38 = vld [vmem:[%s796_s0 + $0x78] sm:$0xff]  ;;  %v212_v40 = vld [vmem:[%s798_s2 + $0x30] sm:$0xff]  ;;  %v214_v42 = vld [vmem:[%s798_s2 + $0x40] sm:$0xff] }
  0x1c   :  { %538 = vmatprep.subr.mxu0 %v54_v7  ;;  %588 = vmatprep.subr.mxu1 %v54_v7  ;;  %v213_v39 = vld [vmem:[%s798_s2 + $0x38] sm:$0xff]  ;;  %v216_v44 = vld [vmem:[%s798_s2 + $0x50] sm:$0xff]  ;;  %v219_v45 = vld [vmem:[%s798_s2 + $0x68] sm:$0xff] }
  0x1d   :  { %539 = vmatpush3.msra.mxu0 %v54_v7  ;;  %604 = vmatpush3.msra.mxu1 %v54_v7  ;;  %v217_v43 = vld [vmem:[%s798_s2 + $0x58] sm:$0xff]  ;;  %v218_v46 = vld [vmem:[%s798_s2 + $0x60] sm:$0xff]  ;;  %v220_v48 = vld [vmem:[%s798_s2 + $0x70] sm:$0xff] }
  0x1e   :  { %540 = vmatprep.subr.mxu0 %v53_v8  ;;  %589 = vmatprep.subr.mxu1 %v53_v8  ;;  %v221_v47 = vld [vmem:[%s798_s2 + $0x78] sm:$0xff]  ;;  %s671_s2 = smov [#allocation5]  }
  0x1f   :  { %541 = vmatpush3.msra.mxu0 %v53_v8  ;;  %605 = vmatpush3.msra.mxu1 %v53_v8  ;;  %s403_s25 = sshll.u32 %s671_s2, 4  ;;  %s404_s25 = int_to_ptr.vmem [resolvable:$true] %s403_s25 }
  0x20   :  { %542 = vmatprep.subr.mxu0 %v52_v9  ;;  %590 = vmatprep.subr.mxu1 %v52_v9  ;;  %s643_s26 = scalar_lea.vmem %s404_s25, 1024  ;;  %p648_p6 = scmp.lt.s32.totalorder %s404_s25, %s404_s25 }
  0x21   :  { %543 = vmatpush3.msra.mxu0 %v52_v9  ;;  %606 = vmatpush3.msra.mxu1 %v52_v9  ;;  %p644_p5 = scmp.ne.s32.totalorder %s404_s25, %s643_s26  ;;  %p649_p7 = scmp.lt.s32.totalorder %s643_s26, %s643_s26 }
  0x22   :  { %544 = vmatprep.subr.mxu0 %v51_v10  ;;  %591 = vmatprep.subr.mxu1 %v51_v10 }
  0x23   :  { %545 = vmatpush3.msra.mxu0 %v51_v10  ;;  %607 = vmatpush3.msra.mxu1 %v51_v10  ;;  %p650_p8 = por %p649_p7, %p648_p6 }
  0x24   :  { %546 = vmatprep.subr.mxu0 %v50_v11  ;;  %592 = vmatprep.subr.mxu1 %v50_v11 }
  0x25   :  { %547 = vmatpush3.msra.mxu0 %v50_v11  ;;  %608 = vmatpush3.msra.mxu1 %v50_v11  ;;  %p651_p9 = pnand %p650_p8, %p644_p5 }
  0x26   :  { %548 = vmatprep.subr.mxu0 %v49_v12  ;;  %593 = vmatprep.subr.mxu1 %v49_v12 }
  0x27   :  { %549 = vmatpush3.msra.mxu0 %v49_v12  ;;  %609 = vmatpush3.msra.mxu1 %v49_v12 }
  0x28   :  { %550 = vmatprep.subr.mxu0 %v48_v13  ;;  %594 = vmatprep.subr.mxu1 %v48_v13 }
  0x29   :  { %551 = vmatpush3.msra.mxu0 %v48_v13  ;;  %610 = vmatpush3.msra.mxu1 %v48_v13 }
  0x2a   :  { %552 = vmatprep.subr.mxu0 %v47_v14  ;;  %595 = vmatprep.subr.mxu1 %v47_v14 }
  0x2b   :  { %553 = vmatpush3.msra.mxu0 %v47_v14  ;;  %611 = vmatpush3.msra.mxu1 %v47_v14 }
  0x2c   :  { %554 = vmatprep.subr.mxu0 %v46_v15  ;;  %596 = vmatprep.subr.mxu1 %v46_v15 }
  0x2d   :  { %555 = vmatpush3.msra.mxu0 %v46_v15  ;;  %612 = vmatpush3.msra.mxu1 %v46_v15 }
  0x2e   :  { %556 = vmatprep.subr.mxu0 %v45_v16  ;;  %597 = vmatprep.subr.mxu1 %v45_v16 }
  0x2f   :  { %557 = vmatpush3.msra.mxu0 %v45_v16  ;;  %613 = vmatpush3.msra.mxu1 %v45_v16 }
  0x30   :  { %558 = vmatprep.mubr.f32.mxu0 %v29_v17  ;;  %570 = vmatprep.mubr.f32.mxu1 %v37_v18 }
  0x31   :  { %559 = vmatmul.mubr.f32.vlgmr.msra.gmra.mxu0 %v30_v19  ;;  %571 = vmatmul.mubr.f32.vlgmr.msra.gmra.mxu1 %v38_v20 }
  0x32   :  { %561 = vmatprep.mubr.f32.mxu0 %v31_v21  ;;  %573 = vmatprep.mubr.f32.mxu1 %v39_v22 }
  0x33   :  { %234 = vperm.xlu1 %622, %v208_v23   ;;  %224 = vperm.xlu0 %621, %v206_v24  }
  0x35   :  { %562 = vmatmul.mubr.f32.gmra.mxu0 %v32_v25  ;;  %574 = vmatmul.mubr.f32.gmra.mxu1 %v40_v26 }
  0x36   :  { %564 = vmatprep.mubr.f32.mxu0 %v33_v27  ;;  %576 = vmatprep.mubr.f32.mxu1 %v41_v28 }
  0x37   :  { %239 = vperm.xlu1 %622, %v209_v29   ;;  %229 = vperm.xlu0 %621, %v207_v30  }
  0x39   :  { %565 = vmatmul.mubr.f32.gmra.mxu0 %v34_v31  ;;  %577 = vmatmul.mubr.f32.gmra.mxu1 %v42_v32 }
  0x3a   :  { %567 = vmatprep.mubr.f32.mxu0 %v35_v33  ;;  %579 = vmatprep.mubr.f32.mxu1 %v43_v34 }
  0x3b   :  { %249 = vperm.xlu1 %622, %v211_v35   ;;  %244 = vperm.xlu0 %621, %v210_v36  }
  0x3d   :  { %568 = vmatmul.mubr.f32.gmra.mxu0 %v36_v37  ;;  %580 = vmatmul.mubr.f32.gmra.mxu1 %v44_v38 }
  0x3f   :  { %259 = vperm.xlu1 %622, %v213_v39   ;;  %254 = vperm.xlu0 %621, %v212_v40  }
  0x43   :  { %269 = vperm.xlu1 %622, %v215_v41   ;;  %264 = vperm.xlu0 %621, %v214_v42  }
  0x47   :  { %279 = vperm.xlu1 %622, %v217_v43   ;;  %274 = vperm.xlu0 %621, %v216_v44  }
  0x4b   :  { %289 = vperm.xlu1 %622, %v219_v45   ;;  %284 = vperm.xlu0 %621, %v218_v46  }
  0x4f   :  { %299 = vperm.xlu1 %622, %v221_v47   ;;  %294 = vperm.xlu0 %621, %v220_v48  }
  0xae   :  { %v235_v49 = vpop.permute.xlu1 %234  ;;  %v225_v50 = vpop.permute.xlu0 %224 }
  0xb2   :  { %v240_v51 = vpop.permute.xlu1 %239  ;;  %v230_v52 = vpop.permute.xlu0 %229 }
  0xb6   :  { %v250_v53 = vpop.permute.xlu1 %249  ;;  %v245_v54 = vpop.permute.xlu0 %244 }
  0xba   :  { %v260_v55 = vpop.permute.xlu1 %259  ;;  %v255_v56 = vpop.permute.xlu0 %254 }
  0xbe   :  { %v270_v57 = vpop.permute.xlu1 %269  ;;  %v265_v58 = vpop.permute.xlu0 %264 }
  0xc2   :  { %v280_v61 = vpop.permute.xlu1 %279  ;;  %v275_v62 = vpop.permute.xlu0 %274 }
  0xc6   :  { %v290_v11 = vpop.permute.xlu1 %289  ;;  %v285_v12 = vpop.permute.xlu0 %284 }
  0xca   :  { %v300_v29 = vpop.permute.xlu1 %299  ;;  %v295_v30 = vpop.permute.xlu0 %294 }
  0xf1   :  { %v560_v59 = vpop.f32.mrf.mxu0  ;;  %v572_v60 = vpop.f32.mrf.mxu1 }
  0xf2   :  { %v303_v1 = vmul.f32 %v560_v59, %v230_v52  ;;  %v311_v2 = vmul.f32 %v572_v60, %v270_v57 }
  0xf3   :  { %v127_v63 = vpop.f32.mrf.mxu0  ;;  %v167_v0 = vpop.f32.mrf.mxu1 }
  0xf4   :  { %v302_v3 = vmul.f32 %v225_v50, %v127_v63  ;;  %v310_v4 = vmul.f32 %v265_v58, %v167_v0 }
  0xf5   :  { %v563_v5 = vpop.f32.mrf.mxu0  ;;  %v575_v6 = vpop.f32.mrf.mxu1 }
  0xf6   :  { %v450_v7 = vpack.c.bf16 %v303_v1, %v302_v3  ;;  %v470_v8 = vpack.c.bf16 %v311_v2, %v310_v4  ;;  %v305_v13 = vmul.f32 %v563_v5, %v240_v51  ;;  %v313_v14 = vmul.f32 %v575_v6, %v280_v61 }
  0xf7   :  { %v137_v9 = vpop.f32.mrf.mxu0  ;;  %v177_v10 = vpop.f32.mrf.mxu1 }
  0xf8   :  { %451 = vst [vmem:[#allocation5] sm:$0xff] %v450_v7   ;;  %490 = vst [vmem:[#allocation5 + $0x20] sm:$0xff] %v470_v8   ;;  %v304_v15 = vmul.f32 %v235_v49, %v137_v9  ;;  %v312_v16 = vmul.f32 %v275_v62, %v177_v10 }
  0xf9   :  { %v566_v17 = vpop.f32.mrf.mxu0  ;;  %v578_v18 = vpop.f32.mrf.mxu1 }
  0xfa   :  { %v455_v19 = vpack.c.bf16 %v305_v13, %v304_v15  ;;  %v475_v20 = vpack.c.bf16 %v313_v14, %v312_v16  ;;  %v307_v23 = vmul.f32 %v566_v17, %v250_v53  ;;  %v315_v24 = vmul.f32 %v578_v18, %v290_v11 }
  0xfb   :  { %v147_v21 = vpop.f32.mrf.mxu0  ;;  %v187_v22 = vpop.f32.mrf.mxu1 }
  0xfc   :  { %487 = vst [vmem:[#allocation5 + $0x8] sm:$0xff] %v455_v19   ;;  %491 = vst [vmem:[#allocation5 + $0x28] sm:$0xff] %v475_v20   ;;  %v306_v25 = vmul.f32 %v245_v54, %v147_v21  ;;  %v314_v26 = vmul.f32 %v285_v12, %v187_v22 }
  0xfd   :  { %v569_v27 = vpop.f32.mrf.mxu0  ;;  %v581_v28 = vpop.f32.mrf.mxu1 }
  0xfe   :  { %v460_v31 = vpack.c.bf16 %v307_v23, %v306_v25  ;;  %v480_v32 = vpack.c.bf16 %v315_v24, %v314_v26  ;;  %v309_v35 = vmul.f32 %v569_v27, %v260_v55  ;;  %v317_v36 = vmul.f32 %v581_v28, %v300_v29 }
  0xff   :  { %v157_v33 = vpop.f32.mrf.mxu0  ;;  %v197_v34 = vpop.f32.mrf.mxu1 }
 0x100   :  { %488 = vst [vmem:[#allocation5 + $0x10] sm:$0xff] %v460_v31   ;;  %492 = vst [vmem:[#allocation5 + $0x30] sm:$0xff] %v480_v32   ;;  %v308_v37 = vmul.f32 %v255_v56, %v157_v33  ;;  %v316_v38 = vmul.f32 %v295_v30, %v197_v34 }
 0x102   :  { %v465_v39 = vpack.c.bf16 %v309_v35, %v308_v37  ;;  %v485_v40 = vpack.c.bf16 %v317_v36, %v316_v38 }
 0x104   :  { %489 = vst [vmem:[#allocation5 + $0x18] sm:$0xff] %v465_v39   ;;  %493 = vst [vmem:[#allocation5 + $0x38] sm:$0xff] %v485_v40  }
 0x105   :  { %654 = shalt.err (!%p651_p9)
}
 0x106   :  { %s672_s27 = smov 64   ;;  %s673_s28 = smov 4  }
 0x107   :  { %409 = dma.vmem_to_hbm [thread:$0]  %s404_s25, 1024, %s799_s3, [#allocation4], %s672_s27, %s672_s27, %s673_s28  }
 0x108   :  { %665 = dma.done.wait [#allocation4], 1024  }
 0x109   :  { %666 = vsyncadd [#allocation4], 4294966272 }
 0x10a   :  { %413 = vsyncpa [#allocation3], 1 }
 0x10b   :  { %414 = vsyncpa [#allocation4], 1 }

</bundles_post_ra>
